<compile_context>
chip_gen: v7x
topology: tpu7x:2x2x1
jax: 0.10.0
libtpu: 0.0.40
codegen_flags: <defaults>
</compile_context>

<pallas_src>
import math

import jax
import jax.numpy as jnp
from jax.experimental import pallas as pl
from jax.experimental.pallas import tpu as pltpu

M_PARAM = 4                # margin m (phiflag=True path of the module)
PI_CONST = 3.14159265      # exact constant used in the PyTorch source

# theta >= j*pi/m  <=>  cos_theta <= cos(j*pi/m)  (cos strictly decreasing on [0,pi])
_THRESH = tuple(math.cos(j * PI_CONST / M_PARAM) for j in range(1, M_PARAM + 1))


def _round_up(a, b):
    return (a + b - 1) // b * b


def _sublane(dtype):
    return {4: 8, 2: 16, 1: 32}.get(jnp.dtype(dtype).itemsize, 8)


def _vmem_estimate(tb, tc, D, itemsize):
    ins = tb * D * itemsize + D * tc * itemsize + 2 * tb * 4
    outs = 2 * tb * tc * itemsize
    scratch = 4 * tb * tc * 4          # f32 matmul result + epilogue temporaries
    return 2 * (ins + outs) + scratch  # double-buffered in/out + scratch


def _compiler_params(vmem_limit, n_axes):
    return pltpu.CompilerParams(
        dimension_semantics=("parallel",) * n_axes,
        vmem_limit_bytes=vmem_limit,
    )


# --------------------------------------------------------------- prep kernels


def _weight_prep_kernel(w_ref, ww_ref):
    """Unit-normalize weight columns.

    Equivalent to PyTorch's `w.renorm(2,1,1e-5).mul(1e5)` followed by dividing by
    the per-column norm wlen: the renorm scale cancels exactly, so folding 1/wlen
    into the prepped weights is just w / ||w||_col.
    """
    w = w_ref[...].astype(jnp.float32)                            # (D, tc)
    colsq = jnp.sum(w * w, axis=0, keepdims=True)                 # (1, tc)
    inv_col = jnp.where(colsq > 0.0, jax.lax.rsqrt(colsq), 0.0)   # 0 for padded cols
    ww_ref[...] = (w * inv_col).astype(ww_ref.dtype)


def _xnorm_kernel(x_ref, xlen_ref, inv_xlen_ref):
    """Per-row L2 norm and its reciprocal, computed once per batch tile."""
    xf = x_ref[...].astype(jnp.float32)                           # (tb, D)
    xsq = jnp.sum(xf * xf, axis=1, keepdims=True)                 # (tb, 1)
    xlen_ref[...] = jnp.sqrt(xsq)
    # Guarded reciprocal: zero-norm (padded) rows give 0 instead of inf/NaN.
    # (PyTorch would yield NaN for an all-zero input row; padded rows are sliced off.)
    inv_xlen_ref[...] = jnp.where(xsq > 0.0, jax.lax.rsqrt(xsq), 0.0)


# ---------------------------------------------------------------- main kernels


def _angular_epilogue(dot, xlen, inv_xlen):
    """dot: (tb, tc) f32 = x @ (w/||w||). Returns (cos*xlen, phi*xlen) in f32."""
    cos_t = jnp.clip(dot * inv_xlen, -1.0, 1.0)
    c2 = cos_t * cos_t
    cos_m = 8.0 * c2 * c2 - 8.0 * c2 + 1.0        # cos(4*theta)
    # k = floor(m*acos(c)/pi) via nested threshold indicators; since the indicators
    # are nested, their alternating sum is the parity of k (no jnp.mod needed).
    i1 = jnp.where(cos_t <= _THRESH[0], 1.0, 0.0)
    i2 = jnp.where(cos_t <= _THRESH[1], 1.0, 0.0)
    i3 = jnp.where(cos_t <= _THRESH[2], 1.0, 0.0)
    i4 = jnp.where(cos_t <= _THRESH[3], 1.0, 0.0)
    k = (i1 + i2) + (i3 + i4)
    parity = (i1 - i2) + (i3 - i4)
    sign = 1.0 - (parity + parity)                # (-1)**k
    phi = sign * cos_m - (k + k)
    return cos_t * xlen, phi * xlen


def _angle_linear_kernel(x_ref, ww_ref, xlen_ref, inv_xlen_ref, cos_ref, phi_ref):
    """Main kernel: weights already column-unit-norm (prepped / cached)."""
    dot = jnp.dot(x_ref[...], ww_ref[...], preferred_element_type=jnp.float32)
    cos_o, phi_o = _angular_epilogue(dot, xlen_ref[...], inv_xlen_ref[...])
    cos_ref[...] = cos_o.astype(cos_ref.dtype)
    phi_ref[...] = phi_o.astype(phi_ref.dtype)


def _angle_linear_fused_kernel(x_ref, w_ref, xlen_ref, inv_xlen_ref, cos_ref, phi_ref):
    """Fused kernel: renorm + column-normalize the raw weight tile in-kernel.

    Used when there is a single batch tile: each weight tile is visited exactly once,
    so the renorm costs nothing extra and no separate prep pass (extra HBM traffic)
    is paid.
    """
    w = w_ref[...].astype(jnp.float32)
    colsq = jnp.sum(w * w, axis=0, keepdims=True)
    inv_col = jnp.where(colsq > 0.0, jax.lax.rsqrt(colsq), 0.0)
    ww = (w * inv_col).astype(x_ref.dtype)
    dot = jnp.dot(x_ref[...], ww, preferred_element_type=jnp.float32)
    cos_o, phi_o = _angular_epilogue(dot, xlen_ref[...], inv_xlen_ref[...])
    cos_ref[...] = cos_o.astype(cos_ref.dtype)
    phi_ref[...] = phi_o.astype(phi_ref.dtype)


# ------------------------------------------------------------------- wrappers


def _prep_weights_padded(w_p, tc, out_dtype, vmem_limit):
    D, C_pad = w_p.shape
    return pl.pallas_call(
        _weight_prep_kernel,
        out_shape=jax.ShapeDtypeStruct((D, C_pad), out_dtype),
        grid_spec=pltpu.PrefetchScalarGridSpec(
            num_scalar_prefetch=0,
            grid=(C_pad // tc,),
            in_specs=[pl.BlockSpec((D, tc), lambda j: (0, j))],
            out_specs=pl.BlockSpec((D, tc), lambda j: (0, j)),
        ),
        compiler_params=_compiler_params(vmem_limit, 1),
    )(w_p)


def prep_weights(w, out_dtype=None, *, block_c=512):
    """Column-normalize w once. Cache the result across calls at inference and pass
    it as `ww=` to angle_linear to skip the per-forward weight prep entirely."""
    D, C = w.shape
    out_dtype = out_dtype if out_dtype is not None else w.dtype
    tc = min(block_c, _round_up(C, 128))
    C_pad = _round_up(C, tc)
    w_p = w if C_pad == C else jnp.pad(w, ((0, 0), (0, C_pad - C)))
    isz = jnp.dtype(w.dtype).itemsize + jnp.dtype(out_dtype).itemsize
    vmem_limit = int(min(64 << 20, max(32 << 20, 2 * (2 * D * tc * isz + D * tc * 4))))
    ww = _prep_weights_padded(w_p, tc, out_dtype, vmem_limit)
    return ww[:, :C]


def angle_linear(x, w, *, ww=None, block_b=256, block_c=512):
    """AngleLinear forward.  x: (B, in_features), w: (in_features, out_features).
    ww: optional pre-normalized weights from prep_weights() (cached at inference).
    Returns (cos_theta * xlen, phi_theta * xlen), each (B, out_features)."""
    B, D = x.shape
    Dw, C = w.shape
    assert D == Dw, "in_features mismatch"

    itemsize = jnp.dtype(x.dtype).itemsize
    sub = _sublane(x.dtype)

    # Tile sizes: lane-dense class tiles (multiples of 128), dtype-aware sublane
    # rounding for the batch tile (8 rows f32, 16 bf16, 32 int8/fp8).
    tb = min(block_b, _round_up(B, sub))
    tc = min(block_c, _round_up(C, 128))

    # v7x has 2 TensorCores: make sure at least one "parallel" grid axis has >= 2
    # blocks for small problems (no effect on correctness; harmless on v5e/v6e).
    if _round_up(B, tb) == tb and _round_up(C, tc) == tc:
        if tc > 128:
            tc = 128
        elif tb > sub:
            tb = max(sub, (tb // 2) // sub * sub)

    # Keep the full-D blocks comfortably inside v7x's 64 MiB physical VMEM
    # (v5e's 16 MiB default scoped limit is raised explicitly below).
    while _vmem_estimate(tb, tc, D, itemsize) > (40 << 20) and tc > 128:
        tc = max(128, (tc // 2) // 128 * 128)
    # TODO(synk): for very large D (>~8k) add a D-reduction grid axis ("arbitrary",
    # last) with an f32 accumulator instead of relying on full-D blocks.

    B_pad = _round_up(B, tb)
    C_pad = _round_up(C, tc)
    nb, nc = B_pad // tb, C_pad // tc

    vmem_limit = int(min(64 << 20, max(32 << 20, 2 * _vmem_estimate(tb, tc, D, itemsize))))

    x_p = x if B_pad == B else jnp.pad(x, ((0, B_pad - B), (0, 0)))

    # Per-row norms, computed once per batch tile (hoisted out of the class sweep).
    xlen, inv_xlen = pl.pallas_call(
        _xnorm_kernel,
        out_shape=(
            jax.ShapeDtypeStruct((B_pad, 1), jnp.float32),
            jax.ShapeDtypeStruct((B_pad, 1), jnp.float32),
        ),
        grid_spec=pltpu.PrefetchScalarGridSpec(
            num_scalar_prefetch=0,
            grid=(nb,),
            in_specs=[pl.BlockSpec((tb, D), lambda i: (i, 0))],
            out_specs=[
                pl.BlockSpec((tb, 1), lambda i: (i, 0)),
                pl.BlockSpec((tb, 1), lambda i: (i, 0)),
            ],
        ),
        compiler_params=_compiler_params(vmem_limit, 1),
    )(x_p)

    # Weight path: cached unit-norm weights, a fused in-kernel renorm (single batch
    # tile), or a one-time prep pass (multiple batch tiles).
    if ww is not None:
        assert ww.shape == (D, C)
        w_in = ww if C_pad == C else jnp.pad(ww, ((0, 0), (0, C_pad - C)))
        kernel = _angle_linear_kernel
    elif nb == 1:
        w_in = w if C_pad == C else jnp.pad(w, ((0, 0), (0, C_pad - C)))
        kernel = _angle_linear_fused_kernel
    else:
        w_p = w if C_pad == C else jnp.pad(w, ((0, 0), (0, C_pad - C)))
        w_in = _prep_weights_padded(w_p, tc, x.dtype, vmem_limit)
        kernel = _angle_linear_kernel

    cost = pl.CostEstimate(
        flops=2 * B_pad * D * C_pad,
        transcendentals=0,
        bytes_accessed=(B_pad * D + D * C_pad + 2 * B_pad * C_pad) * itemsize
        + 2 * B_pad * 4,
    )

    # Grid: class tiles outer, batch tiles inner (fastest) -> the (D, tc) weight
    # block stays VMEM-resident across the batch sweep; only the small x tile and
    # the (tb, 1) norm vectors are re-streamed.
    cos_p, phi_p = pl.pallas_call(
        kernel,
        out_shape=(
            jax.ShapeDtypeStruct((B_pad, C_pad), x.dtype),
            jax.ShapeDtypeStruct((B_pad, C_pad), x.dtype),
        ),
        grid_spec=pltpu.PrefetchScalarGridSpec(
            num_scalar_prefetch=0,
            grid=(nc, nb),
            in_specs=[
                pl.BlockSpec((tb, D), lambda j, i: (i, 0)),   # x batch tile
                pl.BlockSpec((D, tc), lambda j, i: (0, j)),   # weight class tile
                pl.BlockSpec((tb, 1), lambda j, i: (i, 0)),   # xlen
                pl.BlockSpec((tb, 1), lambda j, i: (i, 0)),   # 1/xlen
            ],
            out_specs=[
                pl.BlockSpec((tb, tc), lambda j, i: (i, j)),
                pl.BlockSpec((tb, tc), lambda j, i: (i, j)),
            ],
        ),
        compiler_params=_compiler_params(vmem_limit, 2),
        cost_estimate=cost,
    )(x_p, w_in, xlen, inv_xlen)

    return cos_p[:B, :C], phi_p[:B, :C]


# ------------------------------------------------------------------ reference


def _reference(x, w):
    """Pure-JAX reference following the PyTorch forward. k is computed by
    thresholding against cos(j*pi/m), which equals floor(m*acos(c)/pi) except
    exactly at fp-rounded angular boundaries (measure-zero for random inputs)."""
    x = x.astype(jnp.float32)
    w = w.astype(jnp.float32)
    col_norm = jnp.sqrt(jnp.sum(w * w, axis=0, keepdims=True))
    ww = w * jnp.where(col_norm > 1e-5, 1e-5 / (col_norm + 1e-7), 1.0) * 1e5
    xlen = jnp.sqrt(jnp.sum(x * x, axis=1, keepdims=True))
    wlen = jnp.sqrt(jnp.sum(ww * ww, axis=0, keepdims=True))
    cos_t = jnp.clip(jnp.dot(x, ww) / xlen / wlen, -1.0, 1.0)
    c2 = cos_t * cos_t
    cos_m = 8.0 * c2 * c2 - 8.0 * c2 + 1.0
    k = jnp.zeros_like(cos_t)
    for t in _THRESH:
        k = k + jnp.where(cos_t <= t, 1.0, 0.0)
    phi = (1.0 - 2.0 * jnp.mod(k, 2.0)) * cos_m - 2.0 * k
    return cos_t * xlen, phi * xlen


if __name__ == "__main__":
    def run_case(B, D, C, key):
        kx, kw = jax.random.split(key)
        x = jax.random.normal(kx, (B, D), dtype=jnp.float32)
        # Param init: uniform(-1, 1). (The __init__ renorm is idempotent with the
        # renorm re-applied in the forward pass, so plain uniform init is equivalent.)
        w = jax.random.uniform(kw, (D, C), dtype=jnp.float32, minval=-1.0, maxval=1.0)

        cos_t, phi_t = angle_linear(x, w)
        jax.block_until_ready((cos_t, phi_t))
        assert cos_t.shape == (B, C) and phi_t.shape == (B, C)
        assert bool(jnp.all(jnp.isfinite(cos_t)))
        assert bool(jnp.all(jnp.isfinite(phi_t)))

        cos_r, phi_r = _reference(x, w)
        assert bool(jnp.allclose(cos_t, cos_r, rtol=1e-4, atol=1e-4))
        assert bool(jnp.allclose(phi_t, phi_r, rtol=1e-4, atol=1e-4))

        # Cached-weights path (inference): prep once, reuse across forwards.
        ww = prep_weights(w, x.dtype)
        cos_c, phi_c = angle_linear(x, w, ww=ww)
        jax.block_until_ready((cos_c, phi_c))
        assert bool(jnp.allclose(cos_c, cos_r, rtol=1e-4, atol=1e-4))
        assert bool(jnp.allclose(phi_c, phi_r, rtol=1e-4, atol=1e-4))

    key = jax.random.PRNGKey(0)
    k1, k2 = jax.random.split(key)
    run_case(16, 64, 32, k1)    # multi-batch-tile path (separate weight prep pass)
    run_case(8, 64, 256, k2)    # single-batch-tile path (fused in-kernel renorm)
    print("KERNEL_OK")
</pallas_src>

<mosaic_0001>
module attributes {stable_mosaic.version = 11 : i64} {
  func.func @_xnorm_kernel(%arg0: i32, %arg1: memref<8x64xf32, #tpu.memory_space<vmem>>, %arg2: memref<8x1xf32, #tpu.memory_space<vmem>>, %arg3: memref<8x1xf32, #tpu.memory_space<vmem>>) attributes {dimension_semantics = [#tpu.dimension_semantics<parallel>], iteration_bounds = array<i64: 2>, scalar_prefetch = 0 : i64, scratch_operands = 0 : i64, tpu.core_type = #tpu.core_type<tc>, window_params = [{transform_indices = @transform_0, window_bounds = array<i64: 8, 64>}, {transform_indices = @transform_1, window_bounds = array<i64: 8, 1>}, {transform_indices = @transform_2, window_bounds = array<i64: 8, 1>}]} {
    %c0 = arith.constant 0 : index
    %c0_0 = arith.constant 0 : index
    %0 = vector.load %arg1[%c0, %c0_0] : memref<8x64xf32, #tpu.memory_space<vmem>>, vector<8x64xf32>
    %1 = arith.mulf %0, %0 : vector<8x64xf32>
    %cst = arith.constant dense<0.000000e+00> : vector<8xf32>
    %2 = vector.multi_reduction <add>, %1, %cst [1] : vector<8x64xf32> to vector<8xf32>
    %3 = vector.shape_cast %2 : vector<8xf32> to vector<8x1xf32>
    %4 = math.sqrt %3 : vector<8x1xf32>
    %c0_1 = arith.constant 0 : index
    %c0_2 = arith.constant 0 : index
    %5 = vector.load %arg2[%c0_1, %c0_2] : memref<8x1xf32, #tpu.memory_space<vmem>>, vector<8x1xf32>
    tpu.vector_store %arg2[%c0_1, %c0_2], %4 {strides = array<i32>} : memref<8x1xf32, #tpu.memory_space<vmem>>, vector<8x1xf32>,
    %cst_3 = arith.constant 0.000000e+00 : f32
    %6 = vector.broadcast %cst_3 : f32 to vector<8x1xf32>
    %7 = arith.cmpf ogt, %3, %6 : vector<8x1xf32>
    %8 = math.rsqrt %3 : vector<8x1xf32>
    %cst_4 = arith.constant 0.000000e+00 : f32
    %9 = vector.broadcast %cst_4 : f32 to vector<8x1xf32>
    %10 = arith.select %7, %8, %9 : vector<8x1xi1>, vector<8x1xf32>
    %c0_5 = arith.constant 0 : index
    %c0_6 = arith.constant 0 : index
    %11 = vector.load %arg3[%c0_5, %c0_6] : memref<8x1xf32, #tpu.memory_space<vmem>>, vector<8x1xf32>
    tpu.vector_store %arg3[%c0_5, %c0_6], %10 {strides = array<i32>} : memref<8x1xf32, #tpu.memory_space<vmem>>, vector<8x1xf32>,
    return
  }
  func.func @transform_0(%arg0: i32) -> (i32, i32) {
    %c0_i32 = arith.constant 0 : i32
    %c0_i32_0 = arith.constant 0 : i32
    return %arg0, %c0_i32 : i32, i32
  }
  func.func @transform_1(%arg0: i32) -> (i32, i32) {
    %c0_i32 = arith.constant 0 : i32
    %c0_i32_0 = arith.constant 0 : i32
    return %arg0, %c0_i32 : i32, i32
  }
  func.func @transform_2(%arg0: i32) -> (i32, i32) {
    %c0_i32 = arith.constant 0 : i32
    %c0_i32_0 = arith.constant 0 : i32
    return %arg0, %c0_i32 : i32, i32
  }
}

</mosaic_0001>

<bundles_post_ra>
// kernel: tpu_custom_call.1
= control target key start
LH: loop header
LB: loop body
LE: loop exit
PB: predicated region body
PF: predicated region fallthrough
CT: control target
= control target key end

     0   :  { %8 = vsyncpa [#allocation3], 0  ;;  %s529_s0 = inlined_call_operand.hbm [shape: f32[16,64], index: 0, kind: input, shape index: {}]   ;;  %s530_s1 = inlined_call_operand.vmem [shape: f32[16,1], index: 1, kind: output, shape index: {0}]   ;;  %s531_s2 = inlined_call_operand.vmem [shape: f32[16,1], index: 2, kind: output, shape index: {1}]  }
   0x1   :  { %10 = vsyncpa [#allocation3 + $0x1], 0  ;;  %s419_s9 = smov 0   ;;  %s421_s10 = smov 0  }
   0x2   :  { %s423_s11 = smov 0   ;;  %s425_s12 = smov 0  }
   0x3 LB: > { %s438_s13 = sadd.s32 4294967295, %s401_s12   ;;  %s441_s14 = sadd.s32 1, %s401_s12   ;;  %s401_s12 = sphi %s425_s12, %s539_s12   ;;  %s397_s11 = sphi %s423_s11, %s538_s11   ;;  %s393_s10 = sphi %s421_s10, %s537_s10   ;;  %s389_s9 = sphi %s419_s9, %s536_s9  }
   0x4   : > { %s20_s15 = ssub.s32 %s401_s12, %s441_s14  ;;  %s23_s16 = sadd.s32 1, %s397_s11 }
   0x5   : > { %p21_p0 = scmp.eq.s32.totalorder %s20_s15, 0  ;;  %p30_p1 = scmp.ne.s32.totalorder %s397_s11, %s393_s10 }
   0x6   : > { %p31_p2 = scmp.eq.s32.totalorder %s401_s12, 0  ;;  %p36_p3 = scmp.ne.s32.totalorder %s393_s10, %s389_s9 }
   0x7   : > { %s451_s17 = scalar_select %p21_p0, %s397_s11, %s23_s16  }
   0x8   : > { %p32_p4 = por %p31_p2, %p30_p1  ;;  %p37_p5 = scmp.eq.s32.totalorder %s438_s13, 0 }
   0x9   : > { %p302_p6 = scmp.lt.s32.totalorder %s401_s12, 2  ;;  %s112_s19 = sand.u32 1, %s397_s11  }
   0xa   : > { %p455_p7 = por %p37_p5, %p36_p3  ;;  %s288_s20 = sshll.u32 %s112_s19, 3 }
   0xb   : > { %s289_s21 = sshll.u32 %s401_s12, 7  ;;  %s116_s25 = scalar_lea.vmem [#allocation2], %s288_s20 }
   0xc   : > { %s464_s24 = scalar_lea.hbm %s529_s0, %s289_s21  ;;  %s123_s26 = sshll.u32 %s116_s25, 4  ;;  %s466_s26 = int_to_ptr.vmem [resolvable:$true] %s123_s26 }
   0xd   : > { %p468_p8 = pnand %p302_p6, %p32_p4  ;;  %s113_s28 = scalar_lea.sflag [#allocation3], %s112_s19 }
   0xe   : > { %s337_s29 = scalar_lea.hbm %s464_s24, 128  ;;  %s342_s4 = scalar_lea.hbm %s529_s0, 256 }
   0xf   : > { %p338_p11 = scmp.ne.s32.totalorder %s464_s24, %s337_s29  ;;  %p339_p12 = pneg %p468_p8 }
  0x10   : > { %p343_p1 = scmp.lt.u32.totalorder %s464_s24, %s529_s0  ;;  %p344_p2 = scmp.lt.u32.totalorder %s342_s4, %s337_s29 }
  0x11   : > { %p340_p13 = pnand %p339_p12, %p338_p11  ;;  %p346_p4 = scmp.lt.u32.totalorder %s337_s29, %s464_s24 }
  0x12   : > { %p345_p3 = por %p344_p2, %p343_p1 }
  0x13   : > { %p341_p0 = pneg %p340_p13 }
  0x14   : > { %p347_p5 = por %p346_p4, %p345_p3 }
  0x16   : > { %p348_p6 = pnand %p347_p5, %p341_p0 }
  0x18   : > { %351 = shalt.err (!%p348_p6)
}
  0x19   : > { %s352_s7 = scalar_lea.vmem %s466_s26, 128  ;;  %s403_s8 = smov [#allocation2]  }
  0x1a   : > { %p353_p11 = scmp.ne.s32.totalorder %s466_s26, %s352_s7  ;;  %s357_s9 = sshll.u32 %s403_s8, 4  ;;  %s358_s9 = int_to_ptr.vmem [resolvable:$false] %s357_s9 }
  0x1b   : > { %s359_s15 = scalar_lea.vmem %s358_s9, 256  ;;  %p360_p10 = scmp.lt.s32.totalorder %s466_s26, %s358_s9 }
  0x1c   : > { %p355_p13 = pnand %p353_p11, %p339_p12  ;;  %p361_p1 = scmp.lt.s32.totalorder %s359_s15, %s352_s7 }
  0x1e   : > { %p356_p9 = pneg %p355_p13  ;;  %p362_p2 = por %p361_p1, %p360_p10 }
  0x20   : > { %p363_p3 = pnand %p362_p2, %p356_p9 }
  0x22   : > { %366 = shalt.err (!%p363_p3)
}
  0x23   : > { %301 = dma.hbm_to_vmem [thread:$0]  (!%p468_p8), %s464_s24, 128, %s466_s26, %s113_s28  }
  0x24   : > { %p534_p0 = scmp.lt.s32.totalorder %s401_s12, 3  ;;  %p535_p4 = scmp.ge.s32.totalorder %s401_s12, 1 }
  0x26   : > { %p129_p12 = pnand %p535_p4, %p534_p0 }
  0x27   : > { %s134_s16 = sand.u32 (!%p129_p12), 1, %s393_s10  }
  0x28   : > { %132 = sbr.rel (%p129_p12) target bundleno = 210 (0xd2), region = 24  ;;  %s291_s19 = sshll.u32 (!%p129_p12), %s134_s16, 3 }
  0x29   : > { %s135_s20 = scalar_lea.sflag (!%p129_p12), [#allocation3], %s134_s16  ;;  %s138_s21 = scalar_lea.vmem (!%p129_p12), [#allocation2], %s291_s19 }
  0x2f   : > { %384 = dma.done.wait (%p455_p7), %s135_s20, 128  }
  0x30   : > { %386 = vsyncadd (%p455_p7), %s135_s20, 4294967168  ;;  %v170_v0 = vld [vmem:[%s138_s21] sm:$0xff]  ;;  %vm172_vm0 = vcmask 523264   ;;  %p162_p8 = scmp.lt.s32.totalorder %s438_s13, 1  ;;  %vm183_vm1 = vcmask 7168  }
  0x31   : > { %v171_v1 = vmul.f32 %v170_v0, %v170_v0 }
  0x32   : > { %s541_s13 = smov (!%p162_p8, %s438_s13), 1 }
  0x33   : > { %v173_v2 = vsel %vm172_vm0, %v171_v1, 0.0  ;;  %s292_s12 = sshll.u32 %s541_s13, 3 }
  0x34   : > { %174 = vadd.xlane.f32.xlu0 %v173_v2  ;;  %s169_s24 = scalar_lea.vmem %s531_s2, %s292_s12  ;;  %s165_s26 = scalar_lea.vmem %s530_s1, %s292_s12 }
  0xc1   : > { %v175_v3 = vpop.xlane.xlu0 %174 }
  0xc2   : > { %335 = vrsqrt.f32 %v175_v3  ;;  %vm185_vm2 = vcmp.gt.f32.partialorder %v175_v3, 0.0  ;;  %vm178_vm3 = vcmp.eq.f32.partialorder %v175_v3, inf  ;;  %v181_v7 = vand.u32 2147483648, %v175_v3 }
  0xc3   : > { %vm180_vm4 = vcmp.eq.f32.partialorder %v175_v3, 0.0 }
  0xcc   : > { %v336_v4 = vpop.eup %335 }
  0xcd   : > { %v177_v5 = vmul.f32 %v336_v4, %v175_v3  ;;  %v187_v6 = vsel %vm185_vm2, %v336_v4, 0.0 }
  0xce   : > { %188 = vst.msk [vmem:[%s169_s24] sm:$0xff] %vm183_vm1, %v187_v6 }
  0xcf   : > { %v179_v8 = vsel %vm178_vm3, %v175_v3, %v177_v5 }
  0xd0   : > { %v182_v9 = vsel %vm180_vm4, %v181_v7, %v179_v8 }
  0xd1   : > { %184 = vst.msk [vmem:[%s165_s26] sm:$0xff] %vm183_vm1, %v182_v9 }
  0xd2 PF: > { %p13_p7 = scmp.ge.s32.totalorder %s441_s14, 4   ;;  %s536_s9 = smov %s393_s10 }
  0xd3   : > { %s537_s10 = smov %s397_s11  ;;  %s538_s11 = smov %s451_s17 }
  0xd4   : > { %s539_s12 = smov %s441_s14  ;;  %15 = sbr.rel (!%p13_p7) target bundleno = 3 (0x3), region = 76 }
  0xdb   :  { %222 = vsyncpa [#allocation3], 1 }
  0xdc   :  { %224 = vsyncpa [#allocation3 + $0x1], 1 }

</bundles_post_ra>
